<compile_context>
chip_gen: v6e
topology: v6e:2x2x1
jax: 0.10.0
libtpu: 0.0.40
codegen_flags: <defaults>
</compile_context>

<pallas_src>
import numpy as np
import jax
import jax.numpy as jnp
from jax.experimental import pallas as pl
from jax.experimental.pallas import tpu as pltpu


# ---------------------------------------------------------------------------
# Host-side (static) selection logic.
# ---------------------------------------------------------------------------

def selected_channels(indices_param) -> np.ndarray:
    """Static selected-channel indices (numpy), mirroring the PyTorch module.

    Expose this so downstream consumers can fuse the gather into their own
    kernel (scalar-prefetched index_map) and skip this copy pass entirely.
    """
    try:
        indices_np = np.asarray(indices_param)
    except jax.errors.ConcretizationTypeError as e:
        raise TypeError(
            "Selection: `indices` must be concrete (the selection is static, "
            "mirroring PyTorch's .data.cpu().numpy()); got a traced value."
        ) from e
    selected = np.squeeze(np.argwhere(indices_np))
    if selected.size == 1:
        selected = np.resize(selected, (1,))
    return selected.reshape(-1).astype(np.int64)


def _coalesce_runs(selected: np.ndarray):
    """Collapse sorted selected channel indices into (src, dst, length) runs."""
    runs = []
    i, n = 0, int(selected.shape[0])
    while i < n:
        src = int(selected[i])
        length = 1
        while i + length < n and int(selected[i + length]) == src + length:
            length += 1
        runs.append((src, i, length))  # (src_start, dst_start, run_length)
        i += length
    return runs


# ---------------------------------------------------------------------------
# Path 1: direct HBM->HBM DMAs, bounded issue window, optional dual-TC split.
# ---------------------------------------------------------------------------

_DMA_WINDOW = 8                  # max outstanding DMAs per issuing core
_FRAG_BURST_BYTES = 4096         # per-run contiguous chunk below this -> path 2
_MAX_DIRECT_RUNS = 256           # too many runs -> path 2 (per-DMA overhead)
_MAX_FALLBACK_BLOCK_BYTES = 4 << 20  # keep 2in+2out buffers << 32 MiB VMEM (v7x safe)


def _make_run_dma_kernel(runs, n_cores, window):
    runs_by_core = [runs[c::n_cores] for c in range(n_cores)]

    def _issue(x_hbm, o_hbm, sems, core_runs, sem_row):
        # Bounded rolling window: keep the DMA queues full without stalling
        # the issuing core on oversubscription.
        pending = []
        for r, (src, dst, length) in enumerate(core_runs):
            if len(pending) == window:
                pending.pop(0).wait()
            slot = r % window
            cp = pltpu.make_async_copy(
                x_hbm.at[:, src:src + length],
                o_hbm.at[:, dst:dst + length],
                sems.at[sem_row, slot],
            )
            cp.start()
            pending.append(cp)
        for cp in pending:
            cp.wait()

    def kernel(x_hbm, o_hbm, sems):
        if n_cores == 1:
            _issue(x_hbm, o_hbm, sems, runs_by_core[0], 0)
            return
        core = pl.program_id(0)
        for c in range(n_cores):
            if not runs_by_core[c]:
                continue

            @pl.when(core == c)
            def _run_core(c=c):
                _issue(x_hbm, o_hbm, sems, runs_by_core[c], c)

    return kernel


def _direct_dma_gather(inputs, runs, C_out):
    B, C, H, W = inputs.shape
    itemsize = int(np.dtype(inputs.dtype).itemsize)
    # Split runs across both TensorCores on v7x (sequential, harmless on v5e/v6e).
    n_cores = 2 if len(runs) > 1 else 1
    runs_per_core = max(len(runs[c::n_cores]) for c in range(n_cores))
    window = max(1, min(_DMA_WINDOW, runs_per_core))

    return pl.pallas_call(
        _make_run_dma_kernel(runs, n_cores, window),
        out_shape=jax.ShapeDtypeStruct((B, C_out, H, W), inputs.dtype),
        grid=(n_cores,),
        in_specs=[pl.BlockSpec(memory_space=pl.ANY)],   # raw HBM ref, no auto-DMA
        out_specs=pl.BlockSpec(memory_space=pl.ANY),    # raw HBM ref, written by DMA
        scratch_shapes=[pltpu.SemaphoreType.DMA((n_cores, window))],
        compiler_params=pltpu.CompilerParams(
            dimension_semantics=("parallel",),
            # Output is written only by manual DMAs into an ANY-space ref; keep
            # the side-effect pin (conservative per review item 8).
            has_side_effects=True,
        ),
        cost_estimate=pl.CostEstimate(
            flops=0,
            transcendentals=0,
            bytes_accessed=2 * B * C_out * H * W * itemsize,
        ),
    )(inputs)


# ---------------------------------------------------------------------------
# Path 2: fragmented selections -> BlockSpec-pipelined gather with a
# scalar-prefetched channel map (large double-buffered VMEM blocks instead of
# many sub-KiB HBM->HBM bursts; also covers constant-stride patterns like
# every-other-channel without emitting O(runs) DMA descriptors).
# ---------------------------------------------------------------------------

def _gather_pipeline_kernel(_chan_ref, x_ref, o_ref):
    o_ref[...] = x_ref[...]


def _pipelined_gather(inputs, selected, C_out):
    B, C, H, W = inputs.shape
    itemsize = int(np.dtype(inputs.dtype).itemsize)
    chan = jnp.asarray(selected, dtype=jnp.int32)

    grid_spec = pltpu.PrefetchScalarGridSpec(
        num_scalar_prefetch=1,
        grid=(C_out,),
        # Block = (B, 1, H, W): last two dims equal the full array dims, so the
        # (8,128) divisibility constraint is satisfied for any H, W.
        in_specs=[pl.BlockSpec((B, 1, H, W),
                               lambda c, chan: (0, chan[c], 0, 0))],
        out_specs=pl.BlockSpec((B, 1, H, W),
                               lambda c, chan: (0, c, 0, 0)),
    )
    return pl.pallas_call(
        _gather_pipeline_kernel,
        out_shape=jax.ShapeDtypeStruct((B, C_out, H, W), inputs.dtype),
        grid_spec=grid_spec,
        compiler_params=pltpu.CompilerParams(
            dimension_semantics=("parallel",)),
        cost_estimate=pl.CostEstimate(
            flops=0,
            transcendentals=0,
            bytes_accessed=2 * B * C_out * H * W * itemsize,
        ),
    )(chan, inputs)


# ---------------------------------------------------------------------------
# Public forward.
# ---------------------------------------------------------------------------

def selection_forward(inputs: jax.Array, indices_param) -> jax.Array:
    """Pallas equivalent of Selection.forward.

    inputs:        (B, C, H, W), row-major NCHW.
    indices_param: (C,) parameter; nonzero entries mark selected channels
                   (must be concrete, like PyTorch's .data.cpu().numpy()).
    """
    B, C, H, W = inputs.shape
    itemsize = int(np.dtype(inputs.dtype).itemsize)

    selected = selected_channels(indices_param)
    C_out = int(selected.shape[0])

    # Degenerate case: nothing selected -> zero-channel output, no kernel.
    if C_out == 0:
        return jnp.zeros((B, 0, H, W), dtype=inputs.dtype)

    # Identity fast path: all channels selected in order -> no data movement.
    if C_out == C and np.array_equal(selected, np.arange(C)):
        return inputs

    runs = _coalesce_runs(selected)

    # Dispatch on the static run structure.
    min_chunk_bytes = min(length * H * W * itemsize for (_, _, length) in runs)
    block_bytes = B * H * W * itemsize
    fragmented = (min_chunk_bytes < _FRAG_BURST_BYTES) or (len(runs) > _MAX_DIRECT_RUNS)

    if fragmented and block_bytes <= _MAX_FALLBACK_BLOCK_BYTES:
        return _pipelined_gather(inputs, selected, C_out)
    return _direct_dma_gather(inputs, runs, C_out)


class Selection:
    """Deterministic-parameter stand-in for the nn.Module."""

    def __init__(self, num_channels: int):
        # nn.Parameter(torch.ones(num_channels))
        self.indices = jnp.ones((num_channels,), dtype=jnp.float32)

    def __call__(self, inputs: jax.Array) -> jax.Array:
        return selection_forward(inputs, self.indices)


if __name__ == "__main__":
    key = jax.random.PRNGKey(0)
    k1, k2 = jax.random.split(key)

    # 1) Small, fragmented selection (per-run burst < 4 KiB) -> pipelined
    #    VMEM gather path with scalar-prefetched channel map.
    B, C, H, W = 2, 4, 16, 16
    x = jax.random.normal(k1, (B, C, H, W), dtype=jnp.float32)
    module = Selection(num_channels=C)
    module.indices = jnp.asarray([1.0, 0.0, 1.0, 1.0], dtype=jnp.float32)
    out = jax.block_until_ready(module(x))
    ref = np.asarray(x)[:, [0, 2, 3], :, :]
    np.testing.assert_allclose(np.asarray(out), ref, rtol=0, atol=0)

    # 2) Larger spatial maps (per-run burst >= 4 KiB) -> direct HBM->HBM
    #    run-DMA path with bounded issue window and dual-core run partition.
    B2, C2, H2, W2 = 2, 8, 64, 64
    x2 = jax.random.normal(k2, (B2, C2, H2, W2), dtype=jnp.float32)
    module2 = Selection(num_channels=C2)
    module2.indices = jnp.asarray([1, 0, 1, 1, 0, 1, 1, 1], dtype=jnp.float32)
    out2 = jax.block_until_ready(module2(x2))
    ref2 = np.asarray(x2)[:, [0, 2, 3, 5, 6, 7], :, :]
    np.testing.assert_allclose(np.asarray(out2), ref2, rtol=0, atol=0)

    # 3) Default all-ones parameter: identity fast path (no kernel launch).
    module_all = Selection(num_channels=C)
    out_all = jax.block_until_ready(module_all(x))
    np.testing.assert_allclose(np.asarray(out_all), np.asarray(x), rtol=0, atol=0)

    # 4) Nothing selected: zero-channel output, no kernel.
    module_none = Selection(num_channels=C)
    module_none.indices = jnp.zeros((C,), dtype=jnp.float32)
    out_none = jax.block_until_ready(module_none(x))
    assert out_none.shape == (B, 0, H, W)

    print("KERNEL_OK")
</pallas_src>

<mosaic_0001>
module attributes {stable_mosaic.version = 11 : i64} {
  func.func @_gather_pipeline_kernel(%arg0: i32, %arg1: memref<3xi32, #tpu.memory_space<smem>>, %arg2: memref<2x1x16x16xf32, #tpu.memory_space<vmem>>, %arg3: memref<2x1x16x16xf32, #tpu.memory_space<vmem>>) attributes {dimension_semantics = [#tpu.dimension_semantics<parallel>], iteration_bounds = array<i64: 3>, scalar_prefetch = 1 : i64, scratch_operands = 0 : i64, tpu.core_type = #tpu.core_type<tc>, window_params = [{transform_indices = @transform_0, window_bounds = array<i64: 2, 1, 16, 16>}, {transform_indices = @transform_1, window_bounds = array<i64: 2, 1, 16, 16>}]} {
    %c0 = arith.constant 0 : index
    %c0_0 = arith.constant 0 : index
    %c0_1 = arith.constant 0 : index
    %c0_2 = arith.constant 0 : index
    %0 = vector.load %arg2[%c0, %c0_0, %c0_1, %c0_2] : memref<2x1x16x16xf32, #tpu.memory_space<vmem>>, vector<2x1x16x16xf32>
    %c0_3 = arith.constant 0 : index
    %c0_4 = arith.constant 0 : index
    %c0_5 = arith.constant 0 : index
    %c0_6 = arith.constant 0 : index
    %1 = vector.load %arg3[%c0_3, %c0_4, %c0_5, %c0_6] : memref<2x1x16x16xf32, #tpu.memory_space<vmem>>, vector<2x1x16x16xf32>
    tpu.vector_store %arg3[%c0_3, %c0_4, %c0_5, %c0_6], %0 {strides = array<i32>} : memref<2x1x16x16xf32, #tpu.memory_space<vmem>>, vector<2x1x16x16xf32>,
    return
  }
  func.func @transform_0(%arg0: i32, %arg1: memref<3xi32, #tpu.memory_space<smem>>) -> (i32, i32, i32, i32) {
    %0 = arith.index_cast %arg0 : i32 to index
    %1 = memref.load %arg1[%0] : memref<3xi32, #tpu.memory_space<smem>>
    %c0_i32 = arith.constant 0 : i32
    %c0_i32_0 = arith.constant 0 : i32
    %c0_i32_1 = arith.constant 0 : i32
    %c0_i32_2 = arith.constant 0 : i32
    return %c0_i32, %1, %c0_i32_0, %c0_i32_1 : i32, i32, i32, i32
  }
  func.func @transform_1(%arg0: i32, %arg1: memref<3xi32, #tpu.memory_space<smem>>) -> (i32, i32, i32, i32) {
    %c0_i32 = arith.constant 0 : i32
    %c0_i32_0 = arith.constant 0 : i32
    %c0_i32_1 = arith.constant 0 : i32
    %c0_i32_2 = arith.constant 0 : i32
    return %c0_i32, %arg0, %c0_i32_0, %c0_i32_1 : i32, i32, i32, i32
  }
}

</mosaic_0001>

<bundles_post_ra>
// kernel: tpu_custom_call.1
= control target key start
LH: loop header
LB: loop body
LE: loop exit
PB: predicated region body
PF: predicated region fallthrough
CT: control target
= control target key end

     0   :  { %s474_s9 = smov [#allocation3]   ;;  %s662_s0 = inlined_call_operand.hbm [shape: s32[3], index: 0, kind: input, shape index: {}]   ;;  %s663_s1 = inlined_call_operand.hbm [shape: f32[2,4,16,16], index: 1, kind: input, shape index: {}]   ;;  %s664_s2 = inlined_call_operand.hbm [shape: f32[2,3,16,16], index: 2, kind: output, shape index: {}]  }
   0x1   :  { %8 = dma.hbm_to_smem %s662_s0, 16, %s474_s9, [#allocation2] }
   0x2   :  { %436 = dma.done.wait [#allocation2], 16 }
   0x3   :  { %437 = vsyncadd [#allocation2], 4294967280 }
   0x4   :  { %10 = sfence }
   0x5   :  { %11 = vsyncpa [#allocation5], 0 }
   0x6   :  { %13 = vsyncpa [#allocation5 + $0x1], 0 }
   0x7   :  { %14 = vsyncpa [#allocation6], 0 }
   0x8   :  { %16 = vsyncpa [#allocation6 + $0x1], 0  ;;  %s506_s12 = smov 0   ;;  %s508_s13 = smov 0  }
   0x9   :  { %s510_s14 = smov 0   ;;  %s512_s15 = smov 0  }
   0xa   :  { %s514_s16 = smov 0   ;;  %s516_s17 = smov 0  }
   0xb   :  { %s518_s0 = smov 0  }
   0xc LB: > { %s540_s18 = sadd.s32 4294967295, %s472_s0   ;;  %s288_s19 = sadd.s32 4294967294, %s472_s0   ;;  %s472_s0 = sphi %s518_s0, %s675_s0   ;;  %s468_s17 = sphi %s516_s17, %s674_s17   ;;  %s464_s16 = sphi %s514_s16, %s673_s16   ;;  %s460_s15 = sphi %s512_s15, %s672_s15   ;;  %s456_s14 = sphi %s510_s14, %s671_s14   ;;  %s452_s13 = sphi %s508_s13, %s670_s13   ;;  %s448_s12 = sphi %s506_s12, %s669_s12  }
   0xd   : > { %s544_s20 = sadd.s32 1, %s472_s0   ;;  %s26_s21 = sld [smem:[#allocation3 + %s472_s0]] }
   0xe   : > { %s27_s22 = sld [smem:[#allocation3 + %s544_s20]]  ;;  %s31_s23 = sadd.s32 1, %s468_s17 }
   0xf   : > { %p38_p0 = scmp.ne.s32.totalorder %s468_s17, %s464_s16  ;;  %p39_p1 = scmp.eq.s32.totalorder %s472_s0, 0 }
  0x10   : > { %p44_p2 = scmp.ne.s32.totalorder %s464_s16, %s460_s15  ;;  %p45_p3 = scmp.eq.s32.totalorder %s540_s18, 0 }
  0x11   : > { %p554_p4 = por %p39_p1, %p38_p0  ;;  %s54_s25 = ssub.s32 %s472_s0, %s544_s20 }
  0x12   : > { %p560_p5 = por %p45_p3, %p44_p2  ;;  %p55_p6 = scmp.eq.s32.totalorder %s54_s25, 0 }
  0x13   : > { %s57_s27 = sadd.s32 1, %s456_s14  ;;  %p67_p7 = scmp.ne.s32.totalorder %s456_s14, %s452_s13 }
  0x14   : > { %s28_s28 = ssub.s32 %s26_s21, %s27_s22  ;;  %p68_p8 = scmp.eq.s32.totalorder %s540_s18, 2 }
  0x15   : > { %p29_p9 = scmp.eq.s32.totalorder %s28_s28, 0  ;;  %p73_p10 = scmp.ne.s32.totalorder %s452_s13, %s448_s12 }
  0x16   : > { %s571_s29 = scalar_select %p55_p6, %s456_s14, %s57_s27  }
  0x17   : > { %s574_s30 = scalar_select %p29_p9, %s468_s17, %s31_s23  }
  0x18   : > { %p576_p11 = por %p68_p8, %p67_p7  ;;  %p74_p12 = scmp.eq.s32.totalorder %s288_s19, 2 }
  0x19   : > { %p290_p0 = scmp.ge.s32.totalorder %s472_s0, 3 }
  0x1a   : > { %p580_p13 = por %p74_p12, %p73_p10 }
  0x1b   : > { %90 = sbr.rel (%p290_p0) target bundleno = 48 (0x30), region = 16 }
  0x20   : > { %s94_s5 = sand.u32 1, %s468_s17   ;;  %s475_s7 = smov 1024  }
  0x21   : > { %s291_s6 = sshll.u32 %s94_s5, 5  ;;  %309 = sst [smem:[#allocation9]] (%p554_p4), %s475_s7 }
  0x22   : > { %s306_s8 = scalar_select %p554_p4, [#allocation3], [#allocation12] }
  0x23   : > { %s307_s9 = scalar_select %p554_p4, %s472_s0, 0 }
  0x24   : > { %s308_s10 = scalar_select %p554_p4, [#allocation0], [#allocation13] }
  0x25   : > { %s99_s11 = sld [smem:[%s306_s8 + %s307_s9]]  ;;  %s98_s15 = scalar_lea.vmem [#allocation4], %s291_s6 }
  0x26   : > { %s118_s19 = sshll.u32 %s98_s15, 4  ;;  %s110_s21 = sld [smem:[%s308_s10]]   ;;  %s119_s19 = int_to_ptr.vmem [resolvable:$true] %s118_s19 }
  0x27   : > { %s476_s22 = smov 256   ;;  %s477_s23 = smov 2  }
  0x28   : > { %310 = sst [smem:[#allocation9 + $0x1]] (%p554_p4), %s476_s22  ;;  %s478_s25 = smov 128  }
  0x29   : > { %311 = sst [smem:[#allocation9 + $0x2]] (%p554_p4), %s477_s23  ;;  %s479_s10 = smov 8  }
  0x2a   : > { %312 = sst [smem:[#allocation9 + $0x3]] (%p554_p4), %s478_s25  ;;  %s95_s15 = scalar_lea.sflag [#allocation5], %s94_s5 }
  0x2b   : > { %s304_s27 = sshll.u32 %s99_s11, 8  ;;  %313 = sst [smem:[#allocation9 + $0x4]] (%p554_p4), %s478_s25 }
  0x2c   : > { %s105_s6 = scalar_lea.hbm %s663_s1, %s304_s27  ;;  %s294_s8 = sshll.u32 %s110_s21, 26 }
  0x2d   : > { %s295_s9 = sadd.s32 134217728, %s294_s8  ;;  %314 = sst [smem:[#allocation9 + $0x5]] (%p554_p4), %s479_s10 }
  0x2e   : > { %s480_s22 = smov 131072  }
  0x2f   : > { %315 = dma.general (%p554_p4), %s105_s6, 512, %s119_s19, %s95_s15, %s480_s22, [#allocation9], %s295_s9, 0  }
  0x30 PF: > { %p296_p1 = scmp.ge.s32.totalorder %s472_s0, 1  ;;  %p139_p2 = scmp.lt.s32.totalorder %s472_s0, 4 }
  0x32   : > { %p140_p3 = pnand %p296_p1, %p139_p2 }
  0x33   : > { %s145_s11 = sand.u32 (!%p140_p3), 1, %s464_s16  }
  0x34   : > { %143 = sbr.rel (%p140_p3) target bundleno = 72 (0x48), region = 24  ;;  %s297_s23 = sshll.u32 (!%p140_p3), %s145_s11, 5 }
  0x35   : > { %s146_s21 = scalar_lea.sflag (!%p140_p3), [#allocation5], %s145_s11  ;;  %s149_s25 = scalar_lea.vmem (!%p140_p3), [#allocation4], %s297_s23 }
  0x39   : > { %439 = dma.done.wait (%p560_p5), %s146_s21, 512  }
  0x3a   : > { %441 = vsyncadd (%p560_p5), %s146_s21, 4294966784  ;;  %s165_s24 = sand.u32 1, %s452_s13   ;;  %vm173_vm0 = vcmask 130048   ;;  %v169_v0 = vld [vmem:[%s149_s25] sm:$0xff]  ;;  %v170_v1 = vld [vmem:[%s149_s25 + $0x8] sm:$0xff] }
  0x3b   : > { %s298_s5 = sshll.u32 %s165_s24, 5  ;;  %v171_v2 = vld [vmem:[%s149_s25 + $0x10] sm:$0xff]  ;;  %v172_v3 = vld [vmem:[%s149_s25 + $0x18] sm:$0xff]  ;;  %s179_s27 = scalar_lea.sflag [#allocation6], %s165_s24 }
  0x3c   : > { %s167_s19 = scalar_lea.vmem [#allocation7], %s298_s5 }
  0x3d   : > { %174 = vst.msk [vmem:[%s167_s19] sm:$0xff] %vm173_vm0, %v169_v0  ;;  %175 = vst.msk [vmem:[%s167_s19 + $0x8] sm:$0xff] %vm173_vm0, %v170_v1 }
  0x3e   : > { %176 = vst.msk [vmem:[%s167_s19 + $0x10] sm:$0xff] %vm173_vm0, %v171_v2  ;;  %177 = vst.msk [vmem:[%s167_s19 + $0x18] sm:$0xff] %vm173_vm0, %v172_v3 }
  0x3f   : > { %s305_s26 = sshll.u32 %s540_s18, 8  ;;  %s202_s28 = sshll.u32 %s167_s19, 4  ;;  %s203_s28 = int_to_ptr.vmem [resolvable:$true] %s202_s28 }
  0x40   : > { %s191_s8 = scalar_lea.hbm %s664_s2, %s305_s26  ;;  %s481_s9 = smov 256  }
  0x41   : > { %317 = sst [smem:[#allocation11]] (%p576_p11), %s481_s9  ;;  %s482_s10 = smov 768  }
  0x42   : > { %318 = sst [smem:[#allocation11 + $0x1]] (%p576_p11), %s482_s10  ;;  %s483_s15 = smov 2  }
  0x43   : > { %319 = sst [smem:[#allocation11 + $0x2]] (%p576_p11), %s483_s15  ;;  %s484_s22 = smov 128  }
  0x44   : > { %320 = sst [smem:[#allocation11 + $0x3]] (%p576_p11), %s484_s22  ;;  %s485_s18 = smov 8  }
  0x45   : > { %321 = sst [smem:[#allocation11 + $0x4]] (%p576_p11), %s484_s22  ;;  %s486_s11 = smov 131072  }
  0x46   : > { %322 = sst [smem:[#allocation11 + $0x5]] (%p576_p11), %s485_s18  ;;  %s487_s23 = smov 0  }
  0x47   : > { %323 = dma.general (%p576_p11), %s203_s28, 512, %s191_s8, %s179_s27, %s486_s11, [#allocation11], %s487_s23, 0  }
  0x48 PF: > { %p329_p4 = scmp.ge.s32.totalorder %s472_s0, 2  ;;  %s230_s21 = sand.u32 1, %s448_s12  }
  0x49   : > { %s231_s25 = scalar_lea.sflag [#allocation6], %s230_s21 }
  0x4a   : > { %p326_p5 = pnand %p329_p4, %p580_p13 }
  0x4c   : > { %p327_p6 = pneg %p326_p5 }
  0x4e   : > { %443 = dma.done.wait (%p327_p6), %s231_s25, 512  }
  0x4f   : > { %445 = vsyncadd (%p327_p6), %s231_s25, 4294966784  ;;  %p19_p7 = scmp.ge.s32.totalorder %s544_s20, 5   ;;  %s669_s12 = smov %s452_s13 }
  0x50   : > { %s670_s13 = smov %s456_s14  ;;  %s671_s14 = smov %s571_s29 }
  0x51   : > { %s672_s15 = smov %s464_s16  ;;  %s673_s16 = smov %s468_s17 }
  0x52   : > { %s674_s17 = smov %s574_s30  ;;  %s675_s0 = smov %s544_s20 }
  0x53   :  { %21 = sbr.rel (!%p19_p7) target bundleno = 12 (0xc), region = 79 }
  0x58   :  { %236 = vsyncpa [#allocation5], 1 }
  0x59   :  { %238 = vsyncpa [#allocation5 + $0x1], 1 }
  0x5a   :  { %239 = vsyncpa [#allocation6], 1 }
  0x5b   :  { %241 = vsyncpa [#allocation6 + $0x1], 1 }

</bundles_post_ra>
